<compile_context>
chip_gen: v6e
topology: v6e:2x2x1
jax: 0.10.0
libtpu: 0.0.40
codegen_flags: <defaults>
</compile_context>

<pallas_src>
import functools
import math

import jax
import jax.numpy as jnp
from jax.experimental import pallas as pl
from jax.experimental.pallas import tpu as pltpu


def _round_up(x, m):
    return ((x + m - 1) // m) * m


# Safe on all listed generations (v5e/v6e: 128 MiB physical, v7x: 64 MiB).
_VMEM_LIMIT = 48 * 1024 * 1024


# ---------------------------------------------------------------------------
# Kernel 1: fused QKV projection (one token tile, three lane-dense outputs)
# ---------------------------------------------------------------------------
def qkv_proj_kernel(x_ref, wq_ref, wk_ref, wv_ref, bq_ref, bk_ref, bv_ref,
                    q_ref, k_ref, v_ref):
    # x_ref:  [TQ, H] f32 token tile
    # w*_ref: [H, H]  bf16 pre-transposed weights (VMEM-resident, constant index)
    # b*_ref: [1, H]  f32 biases (Q bias/weight already carry the 1/sqrt(D) scale)
    # outputs: [TQ, H] bf16
    x = x_ref[...].astype(jnp.bfloat16)            # feed the MXU bf16, accumulate f32
    q_ref[...] = (jnp.dot(x, wq_ref[...], preferred_element_type=jnp.float32)
                  + bq_ref[...]).astype(q_ref.dtype)
    k_ref[...] = (jnp.dot(x, wk_ref[...], preferred_element_type=jnp.float32)
                  + bk_ref[...]).astype(k_ref.dtype)
    v_ref[...] = (jnp.dot(x, wv_ref[...], preferred_element_type=jnp.float32)
                  + bv_ref[...]).astype(v_ref.dtype)


# ---------------------------------------------------------------------------
# Kernel 2: all-heads attention for one (batch, q-tile) grid step
# ---------------------------------------------------------------------------
def mha_kernel(q_ref, k_ref, v_ref, m_ref, o_ref, *, num_heads, head_dim):
    # q_ref: [TQ, H] bf16 (pre-scaled by 1/sqrt(D))
    # k_ref: [Sk, H] bf16 ; v_ref: [Sk, H] bf16
    # m_ref: [1, Sk] f32 additive mask (padded keys hold -1e9)
    # o_ref: [TQ, H] f32 — lane-dense output tile
    m = m_ref[...].astype(jnp.float32)                              # [1, Sk]
    q = q_ref[...]
    k = k_ref[...]
    v = v_ref[...]

    ctx_parts = []
    for h in range(num_heads):                                      # static unroll
        lo = h * head_dim
        hi = lo + head_dim
        qh = q[:, lo:hi]                                            # [TQ, D]
        kh = k[:, lo:hi]                                            # [Sk, D]
        vh = v[:, lo:hi]                                            # [Sk, D]
        # scores = qh @ kh^T without an explicit transpose (contract last dims).
        s = jax.lax.dot_general(qh, kh, (((1,), (1,)), ((), ())),
                                preferred_element_type=jnp.float32)  # [TQ, Sk]
        s = s + m                                                    # additive mask
        smax = jnp.max(s, axis=-1, keepdims=True)
        p = jnp.exp(s - smax)                                        # unnormalized
        denom = jnp.sum(p, axis=-1, keepdims=True)                   # [TQ, 1]
        inv = pl.reciprocal(denom, approx=True)                      # EUP slot
        ctxh = jnp.dot(p.astype(v.dtype), vh,                        # bf16 P @ V
                       preferred_element_type=jnp.float32)           # [TQ, D]
        ctx_parts.append(ctxh * inv)                                 # deferred norm

    ctx = jnp.concatenate(ctx_parts, axis=-1)                        # [TQ, H]
    o_ref[...] = ctx.astype(o_ref.dtype)                             # one wide store


# ---------------------------------------------------------------------------
# Wrapper
# ---------------------------------------------------------------------------
def bert_self_attention(hidden_states, attention_mask, params, num_heads):
    """hidden_states [B,S,H], attention_mask [B,1,1,S] (additive) -> [B,S,H]."""
    B, S, H = hidden_states.shape
    nh = num_heads
    D = H // nh
    assert nh * D == H

    scale = 1.0 / math.sqrt(D)

    # nn.Linear weights are [out, in]; pre-transpose to [in, out] and fold the
    # 1/sqrt(D) attention scale into the Q projection (exact, zero runtime cost).
    wq = (params["wq"].T * scale).astype(jnp.bfloat16)              # [H, H]
    wk = params["wk"].T.astype(jnp.bfloat16)
    wv = params["wv"].T.astype(jnp.bfloat16)
    bq = (params["bq"] * scale).reshape(1, H).astype(jnp.float32)   # [1, H]
    bk = params["bk"].reshape(1, H).astype(jnp.float32)
    bv = params["bv"].reshape(1, H).astype(jnp.float32)

    # Sequence padding: sublane-friendly and divisible by the q tile.
    S8 = _round_up(S, 8)
    TQ = min(128, S8)
    S_pad = _round_up(S8, TQ)

    x = hidden_states.astype(jnp.float32)
    if S_pad != S:
        x = jnp.pad(x, ((0, 0), (0, S_pad - S), (0, 0)))

    mask = attention_mask.astype(jnp.float32).reshape(B, 1, S)
    if S_pad != S:
        mask = jnp.pad(mask, ((0, 0), (0, 0), (0, S_pad - S)),
                       constant_values=-1e9)                        # mask padded keys

    grid = (B, S_pad // TQ)
    n_tok = B * S_pad

    # ---- Kernel 1: QKV projection ---------------------------------------
    proj_cost = pl.CostEstimate(
        flops=2 * n_tok * H * 3 * H,
        transcendentals=0,
        bytes_accessed=(n_tok * H * 4          # x (f32)
                        + 3 * H * H * 2        # weights (bf16)
                        + 3 * H * 4            # biases
                        + 3 * n_tok * H * 2),  # q/k/v out (bf16)
    )
    const_spec_w = pl.BlockSpec((H, H), lambda b, i: (0, 0))        # VMEM-resident
    const_spec_b = pl.BlockSpec((1, H), lambda b, i: (0, 0))
    tok_in_spec = pl.BlockSpec((None, TQ, H), lambda b, i: (b, i, 0))
    tok_out_spec = pl.BlockSpec((None, TQ, H), lambda b, i: (b, i, 0))

    q, k, v = pl.pallas_call(
        qkv_proj_kernel,
        out_shape=(jax.ShapeDtypeStruct((B, S_pad, H), jnp.bfloat16),
                   jax.ShapeDtypeStruct((B, S_pad, H), jnp.bfloat16),
                   jax.ShapeDtypeStruct((B, S_pad, H), jnp.bfloat16)),
        grid_spec=pltpu.PrefetchScalarGridSpec(
            num_scalar_prefetch=0,
            grid=grid,
            in_specs=[tok_in_spec,
                      const_spec_w, const_spec_w, const_spec_w,
                      const_spec_b, const_spec_b, const_spec_b],
            out_specs=[tok_out_spec, tok_out_spec, tok_out_spec],
        ),
        compiler_params=pltpu.CompilerParams(
            dimension_semantics=("parallel", "parallel"),
            vmem_limit_bytes=_VMEM_LIMIT),
        cost_estimate=proj_cost,
    )(x, wq, wk, wv, bq, bk, bv)

    # ---- Kernel 2: attention (all heads per step, lane-dense output) ----
    attn_cost = pl.CostEstimate(
        flops=4 * B * S_pad * S_pad * H,                 # QK^T + PV over all heads
        transcendentals=B * nh * S_pad * S_pad,          # exp
        bytes_accessed=(3 * B * S_pad * H * 2            # q, k, v (bf16, k/v resident per b)
                        + B * S_pad * 4                  # mask
                        + B * S_pad * H * 4),            # ctx out (f32)
    )
    ctx = pl.pallas_call(
        functools.partial(mha_kernel, num_heads=nh, head_dim=D),
        out_shape=jax.ShapeDtypeStruct((B, S_pad, H), jnp.float32),
        grid_spec=pltpu.PrefetchScalarGridSpec(
            num_scalar_prefetch=0,
            grid=grid,
            in_specs=[
                pl.BlockSpec((None, TQ, H), lambda b, i: (b, i, 0)),      # Q tile
                pl.BlockSpec((None, S_pad, H), lambda b, i: (b, 0, 0)),   # K (resident)
                pl.BlockSpec((None, S_pad, H), lambda b, i: (b, 0, 0)),   # V (resident)
                pl.BlockSpec((None, 1, S_pad), lambda b, i: (b, 0, 0)),   # mask
            ],
            out_specs=pl.BlockSpec((None, TQ, H), lambda b, i: (b, i, 0)),
        ),
        compiler_params=pltpu.CompilerParams(
            dimension_semantics=("parallel", "parallel"),
            vmem_limit_bytes=_VMEM_LIMIT),
        cost_estimate=attn_cost,
    )(q, k, v, mask)

    return ctx[:, :S, :]                                  # already [B, S, H], no transpose


# ---------------------------------------------------------------------------
# Params & reference
# ---------------------------------------------------------------------------
def make_params(key, hidden_size):
    ks = jax.random.split(key, 6)
    s = 0.02
    return {
        "wq": jax.random.normal(ks[0], (hidden_size, hidden_size), jnp.float32) * s,
        "bq": jax.random.normal(ks[1], (hidden_size,), jnp.float32) * s,
        "wk": jax.random.normal(ks[2], (hidden_size, hidden_size), jnp.float32) * s,
        "bk": jax.random.normal(ks[3], (hidden_size,), jnp.float32) * s,
        "wv": jax.random.normal(ks[4], (hidden_size, hidden_size), jnp.float32) * s,
        "bv": jax.random.normal(ks[5], (hidden_size,), jnp.float32) * s,
    }


def _reference(hidden_states, attention_mask, params, num_heads):
    x = hidden_states.astype(jnp.float32)
    B, S, H = x.shape
    D = H // num_heads
    q = x @ params["wq"].T + params["bq"]
    k = x @ params["wk"].T + params["bk"]
    v = x @ params["wv"].T + params["bv"]

    def split(t):
        return t.reshape(B, S, num_heads, D).transpose(0, 2, 1, 3)

    q, k, v = split(q), split(k), split(v)
    scores = jnp.einsum("bhqd,bhkd->bhqk", q, k) / math.sqrt(D)
    scores = scores + attention_mask
    probs = jax.nn.softmax(scores, axis=-1)
    ctx = jnp.einsum("bhqk,bhkd->bhqd", probs, v)
    return ctx.transpose(0, 2, 1, 3).reshape(B, S, H)


if __name__ == "__main__":
    B, S, H, NH = 2, 8, 32, 4
    key = jax.random.PRNGKey(0)
    kx, kp = jax.random.split(key)
    hidden_states = jax.random.normal(kx, (B, S, H), jnp.float32)
    params = make_params(kp, H)

    # BERT-style additive mask [B,1,1,S]: 0 -> attend, -10000 -> masked.
    keep = jnp.ones((B, S), jnp.float32).at[1, -2:].set(0.0)
    attention_mask = (1.0 - keep)[:, None, None, :] * -10000.0

    out = bert_self_attention(hidden_states, attention_mask, params, NH)
    out = jax.block_until_ready(out)

    ref = _reference(hidden_states, attention_mask, params, NH)
    assert out.shape == (B, S, H)
    # bf16 matmul operands with f32 accumulation -> compare with a bf16-level tolerance.
    assert jnp.allclose(out, ref, atol=1e-2, rtol=1e-2), "mismatch vs reference"

    print("KERNEL_OK")
</pallas_src>

<mosaic_0001>
module attributes {stable_mosaic.version = 11 : i64} {
  func.func @qkv_proj_kernel(%arg0: i32, %arg1: i32, %arg2: memref<1x8x32xf32, #tpu.memory_space<vmem>>, %arg3: memref<32x32xbf16, #tpu.memory_space<vmem>>, %arg4: memref<32x32xbf16, #tpu.memory_space<vmem>>, %arg5: memref<32x32xbf16, #tpu.memory_space<vmem>>, %arg6: memref<1x32xf32, #tpu.memory_space<vmem>>, %arg7: memref<1x32xf32, #tpu.memory_space<vmem>>, %arg8: memref<1x32xf32, #tpu.memory_space<vmem>>, %arg9: memref<1x8x32xbf16, #tpu.memory_space<vmem>>, %arg10: memref<1x8x32xbf16, #tpu.memory_space<vmem>>, %arg11: memref<1x8x32xbf16, #tpu.memory_space<vmem>>) attributes {dimension_semantics = [#tpu.dimension_semantics<parallel>, #tpu.dimension_semantics<parallel>], iteration_bounds = array<i64: 2, 1>, scalar_prefetch = 0 : i64, scratch_operands = 0 : i64, tpu.core_type = #tpu.core_type<tc>, window_params = [{transform_indices = @transform_0, window_bounds = array<i64: 1, 8, 32>}, {pipeline_mode = #tpu.pipeline_mode<synchronous>, transform_indices = @transform_1, window_bounds = array<i64: 32, 32>}, {pipeline_mode = #tpu.pipeline_mode<synchronous>, transform_indices = @transform_2, window_bounds = array<i64: 32, 32>}, {pipeline_mode = #tpu.pipeline_mode<synchronous>, transform_indices = @transform_3, window_bounds = array<i64: 32, 32>}, {pipeline_mode = #tpu.pipeline_mode<synchronous>, transform_indices = @transform_4, window_bounds = array<i64: 1, 32>}, {pipeline_mode = #tpu.pipeline_mode<synchronous>, transform_indices = @transform_5, window_bounds = array<i64: 1, 32>}, {pipeline_mode = #tpu.pipeline_mode<synchronous>, transform_indices = @transform_6, window_bounds = array<i64: 1, 32>}, {transform_indices = @transform_7, window_bounds = array<i64: 1, 8, 32>}, {transform_indices = @transform_8, window_bounds = array<i64: 1, 8, 32>}, {transform_indices = @transform_9, window_bounds = array<i64: 1, 8, 32>}]} {
    %c0 = arith.constant 0 : index
    %c0_0 = arith.constant 0 : index
    %c0_1 = arith.constant 0 : index
    %0 = vector.load %arg2[%c0, %c0_0, %c0_1] : memref<1x8x32xf32, #tpu.memory_space<vmem>>, vector<1x8x32xf32>
    %1 = vector.shape_cast %0 : vector<1x8x32xf32> to vector<8x32xf32>
    %2 = arith.truncf %1 : vector<8x32xf32> to vector<8x32xbf16>
    %c0_2 = arith.constant 0 : index
    %c0_3 = arith.constant 0 : index
    %3 = vector.load %arg3[%c0_2, %c0_3] : memref<32x32xbf16, #tpu.memory_space<vmem>>, vector<32x32xbf16>
    %cst = arith.constant dense<0.000000e+00> : vector<8x32xf32>
    %4 = tpu.matmul %2, %3, %cst {dimension_numbers = #tpu.dot_dimension_numbers<[1], [0], [0], [1], [0, 0, 1, 1], [], []>} : vector<8x32xbf16>, vector<32x32xbf16>, vector<8x32xf32> -> vector<8x32xf32>
    %c0_4 = arith.constant 0 : index
    %c0_5 = arith.constant 0 : index
    %5 = vector.load %arg6[%c0_4, %c0_5] : memref<1x32xf32, #tpu.memory_space<vmem>>, vector<1x32xf32>
    %6 = vector.broadcast %5 : vector<1x32xf32> to vector<8x32xf32>
    %7 = arith.addf %4, %6 : vector<8x32xf32>
    %8 = arith.truncf %7 : vector<8x32xf32> to vector<8x32xbf16>
    %c0_6 = arith.constant 0 : index
    %c0_7 = arith.constant 0 : index
    %c0_8 = arith.constant 0 : index
    %9 = vector.load %arg9[%c0_6, %c0_7, %c0_8] : memref<1x8x32xbf16, #tpu.memory_space<vmem>>, vector<1x8x32xbf16>
    %10 = vector.shape_cast %9 : vector<1x8x32xbf16> to vector<8x32xbf16>
    %11 = vector.shape_cast %8 : vector<8x32xbf16> to vector<1x8x32xbf16>
    tpu.vector_store %arg9[%c0_6, %c0_7, %c0_8], %11 {strides = array<i32>} : memref<1x8x32xbf16, #tpu.memory_space<vmem>>, vector<1x8x32xbf16>,
    %c0_9 = arith.constant 0 : index
    %c0_10 = arith.constant 0 : index
    %12 = vector.load %arg4[%c0_9, %c0_10] : memref<32x32xbf16, #tpu.memory_space<vmem>>, vector<32x32xbf16>
    %cst_11 = arith.constant dense<0.000000e+00> : vector<8x32xf32>
    %13 = tpu.matmul %2, %12, %cst_11 {dimension_numbers = #tpu.dot_dimension_numbers<[1], [0], [0], [1], [0, 0, 1, 1], [], []>} : vector<8x32xbf16>, vector<32x32xbf16>, vector<8x32xf32> -> vector<8x32xf32>
    %c0_12 = arith.constant 0 : index
    %c0_13 = arith.constant 0 : index
    %14 = vector.load %arg7[%c0_12, %c0_13] : memref<1x32xf32, #tpu.memory_space<vmem>>, vector<1x32xf32>
    %15 = vector.broadcast %14 : vector<1x32xf32> to vector<8x32xf32>
    %16 = arith.addf %13, %15 : vector<8x32xf32>
    %17 = arith.truncf %16 : vector<8x32xf32> to vector<8x32xbf16>
    %c0_14 = arith.constant 0 : index
    %c0_15 = arith.constant 0 : index
    %c0_16 = arith.constant 0 : index
    %18 = vector.load %arg10[%c0_14, %c0_15, %c0_16] : memref<1x8x32xbf16, #tpu.memory_space<vmem>>, vector<1x8x32xbf16>
    %19 = vector.shape_cast %18 : vector<1x8x32xbf16> to vector<8x32xbf16>
    %20 = vector.shape_cast %17 : vector<8x32xbf16> to vector<1x8x32xbf16>
    tpu.vector_store %arg10[%c0_14, %c0_15, %c0_16], %20 {strides = array<i32>} : memref<1x8x32xbf16, #tpu.memory_space<vmem>>, vector<1x8x32xbf16>,
    %c0_17 = arith.constant 0 : index
    %c0_18 = arith.constant 0 : index
    %21 = vector.load %arg5[%c0_17, %c0_18] : memref<32x32xbf16, #tpu.memory_space<vmem>>, vector<32x32xbf16>
    %cst_19 = arith.constant dense<0.000000e+00> : vector<8x32xf32>
    %22 = tpu.matmul %2, %21, %cst_19 {dimension_numbers = #tpu.dot_dimension_numbers<[1], [0], [0], [1], [0, 0, 1, 1], [], []>} : vector<8x32xbf16>, vector<32x32xbf16>, vector<8x32xf32> -> vector<8x32xf32>
    %c0_20 = arith.constant 0 : index
    %c0_21 = arith.constant 0 : index
    %23 = vector.load %arg8[%c0_20, %c0_21] : memref<1x32xf32, #tpu.memory_space<vmem>>, vector<1x32xf32>
    %24 = vector.broadcast %23 : vector<1x32xf32> to vector<8x32xf32>
    %25 = arith.addf %22, %24 : vector<8x32xf32>
    %26 = arith.truncf %25 : vector<8x32xf32> to vector<8x32xbf16>
    %c0_22 = arith.constant 0 : index
    %c0_23 = arith.constant 0 : index
    %c0_24 = arith.constant 0 : index
    %27 = vector.load %arg11[%c0_22, %c0_23, %c0_24] : memref<1x8x32xbf16, #tpu.memory_space<vmem>>, vector<1x8x32xbf16>
    %28 = vector.shape_cast %27 : vector<1x8x32xbf16> to vector<8x32xbf16>
    %29 = vector.shape_cast %26 : vector<8x32xbf16> to vector<1x8x32xbf16>
    tpu.vector_store %arg11[%c0_22, %c0_23, %c0_24], %29 {strides = array<i32>} : memref<1x8x32xbf16, #tpu.memory_space<vmem>>, vector<1x8x32xbf16>,
    return
  }
  func.func @transform_0(%arg0: i32, %arg1: i32) -> (i32, i32, i32) {
    %c0_i32 = arith.constant 0 : i32
    %c0_i32_0 = arith.constant 0 : i32
    return %arg0, %arg1, %c0_i32 : i32, i32, i32
  }
  func.func @transform_1(%arg0: i32, %arg1: i32) -> (i32, i32) {
    %c0_i32 = arith.constant 0 : i32
    %c0_i32_0 = arith.constant 0 : i32
    %c0_i32_1 = arith.constant 0 : i32
    return %c0_i32, %c0_i32_0 : i32, i32
  }
  func.func @transform_2(%arg0: i32, %arg1: i32) -> (i32, i32) {
    %c0_i32 = arith.constant 0 : i32
    %c0_i32_0 = arith.constant 0 : i32
    %c0_i32_1 = arith.constant 0 : i32
    return %c0_i32, %c0_i32_0 : i32, i32
  }
  func.func @transform_3(%arg0: i32, %arg1: i32) -> (i32, i32) {
    %c0_i32 = arith.constant 0 : i32
    %c0_i32_0 = arith.constant 0 : i32
    %c0_i32_1 = arith.constant 0 : i32
    return %c0_i32, %c0_i32_0 : i32, i32
  }
  func.func @transform_4(%arg0: i32, %arg1: i32) -> (i32, i32) {
    %c0_i32 = arith.constant 0 : i32
    %c0_i32_0 = arith.constant 0 : i32
    %c0_i32_1 = arith.constant 0 : i32
    return %c0_i32, %c0_i32_0 : i32, i32
  }
  func.func @transform_5(%arg0: i32, %arg1: i32) -> (i32, i32) {
    %c0_i32 = arith.constant 0 : i32
    %c0_i32_0 = arith.constant 0 : i32
    %c0_i32_1 = arith.constant 0 : i32
    return %c0_i32, %c0_i32_0 : i32, i32
  }
  func.func @transform_6(%arg0: i32, %arg1: i32) -> (i32, i32) {
    %c0_i32 = arith.constant 0 : i32
    %c0_i32_0 = arith.constant 0 : i32
    %c0_i32_1 = arith.constant 0 : i32
    return %c0_i32, %c0_i32_0 : i32, i32
  }
  func.func @transform_7(%arg0: i32, %arg1: i32) -> (i32, i32, i32) {
    %c0_i32 = arith.constant 0 : i32
    %c0_i32_0 = arith.constant 0 : i32
    return %arg0, %arg1, %c0_i32 : i32, i32, i32
  }
  func.func @transform_8(%arg0: i32, %arg1: i32) -> (i32, i32, i32) {
    %c0_i32 = arith.constant 0 : i32
    %c0_i32_0 = arith.constant 0 : i32
    return %arg0, %arg1, %c0_i32 : i32, i32, i32
  }
  func.func @transform_9(%arg0: i32, %arg1: i32) -> (i32, i32, i32) {
    %c0_i32 = arith.constant 0 : i32
    %c0_i32_0 = arith.constant 0 : i32
    return %arg0, %arg1, %c0_i32 : i32, i32, i32
  }
}

</mosaic_0001>

<bundles_post_ra>
// kernel: tpu_custom_call.1
= control target key start
LH: loop header
LB: loop body
LE: loop exit
PB: predicated region body
PF: predicated region fallthrough
CT: control target
= control target key end

     0   :  { %s1634_s0 = inlined_call_operand.hbm [shape: f32[2,8,32], index: 0, kind: input, shape index: {}]   ;;  %s1635_s1 = inlined_call_operand.hbm [shape: bf16[32,32], index: 1, kind: input, shape index: {}]   ;;  %s1636_s2 = inlined_call_operand.hbm [shape: bf16[32,32], index: 2, kind: input, shape index: {}]   ;;  %s1637_s3 = inlined_call_operand.hbm [shape: bf16[32,32], index: 3, kind: input, shape index: {}]   ;;  %s1638_s4 = inlined_call_operand.vmem [shape: f32[1,32], index: 4, kind: input, shape index: {}]   ;;  %s1639_s5 = inlined_call_operand.vmem [shape: f32[1,32], index: 5, kind: input, shape index: {}]   ;;  %s1640_s6 = inlined_call_operand.vmem [shape: f32[1,32], index: 6, kind: input, shape index: {}]   ;;  %s1641_s7 = inlined_call_operand.hbm [shape: bf16[2,8,32], index: 7, kind: output, shape index: {0}]   ;;  %s1642_s8 = inlined_call_operand.hbm [shape: bf16[2,8,32], index: 8, kind: output, shape index: {1}]   ;;  %s1643_s9 = inlined_call_operand.hbm [shape: bf16[2,8,32], index: 9, kind: output, shape index: {2}]  }
   0x1   :  { %1649 = sst [smem:[#allocation21_spill]] %s1635_s1 }
   0x2   :  { %1650 = sst [smem:[#allocation22_spill]] %s1636_s2 }
   0x3   :  { %1651 = sst [smem:[#allocation23_spill]] %s1637_s3 }
   0x4   :  { %15 = vsyncpa [#allocation3], 0 }
   0x5   :  { %17 = vsyncpa [#allocation3 + $0x1], 0 }
   0x6   :  { %18 = vsyncpa [#allocation6], 0 }
   0x7   :  { %19 = vsyncpa [#allocation9], 0 }
   0x8   :  { %20 = vsyncpa [#allocation4], 0 }
   0x9   :  { %22 = vsyncpa [#allocation4 + $0x1], 0 }
   0xa   :  { %23 = vsyncpa [#allocation12], 0 }
   0xb   :  { %25 = vsyncpa [#allocation12 + $0x1], 0  ;;  %s1355_s30 = smov 0   ;;  %s1357_s10 = smov 0  }
   0xc   :  { %s1359_s11 = smov 0   ;;  %s1361_s12 = smov 0  }
   0xd   :  { %s1363_s13 = smov 0   ;;  %s1365_s14 = smov 0  }
   0xe LB: > { %s1386_s15 = sadd.s32 4294967295, %s1292_s14   ;;  %s1645_s16 = sadd.s32 4294967294, %s1292_s14   ;;  %s1292_s14 = sphi %s1365_s14, %s31_s14   ;;  %s1288_s13 = sphi %s1363_s13, %s1679_s13   ;;  %s1284_s12 = sphi %s1361_s12, %s1678_s12   ;;  %s1280_s11 = sphi %s1359_s11, %s1677_s11   ;;  %s1276_s10 = sphi %s1357_s10, %s1676_s10   ;;  %s1272_s30 = sphi %s1355_s30, %s1675_s30  }
   0xf   : > { %p65_p0 = scmp.ne.s32.totalorder %s1276_s10, %s1272_s30  ;;  %p1644_p1 = scmp.eq.s32.totalorder %s1386_s15, 0 }
  0x10   : > { %p223_p3 = scmp.eq.s32.totalorder %s1645_s16, 1  ;;  %p861_p5 = scmp.ge.s32.totalorder %s1292_s14, 1 }
  0x11   : > { %p1397_p4 = por %p1644_p1, %p65_p0  ;;  %p286_p7 = scmp.lt.s32.totalorder %s1292_s14, 3 }
  0x12   : > { %p1402_p6 = por %p223_p3, %p65_p0  ;;  %s1294_s20 = smov [#allocation5]  }
  0x13   : > { %s1652_s17 = scalar_select %p1397_p4, 1, 0 }
  0x14   : > { %s1653_s18 = scalar_select %p1402_p6, 1, 0 }
  0x15   : > { %p1407_p8 = pnand %p861_p5, %p286_p7  ;;  %s298_s21 = sshll.u32 %s1294_s20, 4  ;;  %s299_s21 = int_to_ptr.vmem [resolvable:$true] %s298_s21 }
  0x16   : > { %1654 = sst [smem:[#allocation19_spill]] %s1653_s18  ;;  %s1295_s23 = smov [#allocation7]  }
  0x17   : > { %p949_p9 = pneg %p1407_p8  ;;  %s311_s24 = sshll.u32 %s1295_s23, 4  ;;  %s312_s24 = int_to_ptr.vmem [resolvable:$true] %s311_s24 }
  0x18   : > { %s1296_s25 = smov [#allocation8]   ;;  %s1053_s27 = scalar_lea.vmem %s299_s21, 256 }
  0x19   : > { %p1416_p11 = pnand %p949_p9, %p1644_p1  ;;  %s324_s26 = sshll.u32 %s1296_s25, 4  ;;  %s325_s26 = int_to_ptr.vmem [resolvable:$true] %s324_s26 }
  0x1a   : > { %p1054_p13 = scmp.ne.s32.totalorder %s299_s21, %s1053_s27  ;;  %p1061_p5 = scmp.lt.s32.totalorder %s299_s21, %s299_s21 }
  0x1b   : > { %p1044_p12 = pneg %p1416_p11  ;;  %p1062_p7 = scmp.lt.s32.totalorder %s1053_s27, %s1053_s27 }
  0x1d   : > { %p1056_p0 = pnand %p1054_p13, %p1044_p12  ;;  %p1063_p9 = por %p1062_p7, %p1061_p5 }
  0x1f   : > { %p1057_p3 = pneg %p1056_p0 }
  0x21   : > { %p1064_p10 = pnand %p1063_p9, %p1057_p3 }
  0x23   : > { %1067 = shalt.err (!%p1064_p10)
}
  0x24   : > { %s1297_s28 = smov 64   ;;  %s1298_s29 = smov 4  }
  0x25   : > { %s1657_s1 = sld [smem:[#allocation21_spill]]  ;;  %s1079_s25 = scalar_lea.vmem %s312_s24, 256 }
  0x26   : > { %p1080_p1 = scmp.ne.s32.totalorder %s312_s24, %s1079_s25  ;;  %p1087_p2 = scmp.lt.s32.totalorder %s312_s24, %s312_s24 }
  0x27   : > { %p1088_p6 = scmp.lt.s32.totalorder %s1079_s25, %s1079_s25 }
  0x28   : > { %p1082_p13 = pnand %p1080_p1, %p1044_p12 }
  0x29   : > { %p1089_p5 = por %p1088_p6, %p1087_p2 }
  0x2a   : > { %p1083_p0 = pneg %p1082_p13 }
  0x2b   : > { %952 = dma.hbm_to_vmem [thread:$0]  (!%p1416_p11), %s1657_s1, 256, %s299_s21, [#allocation6], %s1297_s28, %s1297_s28, %s1298_s29  }
  0x2c   : > { %p1090_p3 = pnand %p1089_p5, %p1083_p0 }
  0x2e   : > { %1093 = shalt.err (!%p1090_p3)
}
  0x2f   : > { %s1658_s2 = sld [smem:[#allocation22_spill]]  ;;  %s1105_s21 = scalar_lea.vmem %s325_s26, 256 }
  0x30   : > { %p1106_p10 = scmp.ne.s32.totalorder %s325_s26, %s1105_s21  ;;  %p1113_p9 = scmp.lt.s32.totalorder %s325_s26, %s325_s26 }
  0x31   : > { %p1114_p13 = scmp.lt.s32.totalorder %s1105_s21, %s1105_s21 }
  0x32   : > { %p1108_p7 = pnand %p1106_p10, %p1044_p12 }
  0x33   : > { %p1115_p4 = por %p1114_p13, %p1113_p9 }
  0x34   : > { %p1109_p1 = pneg %p1108_p7 }
  0x35   : > { %955 = dma.hbm_to_vmem [thread:$0]  (!%p1416_p11), %s1658_s2, 256, %s312_s24, [#allocation6], %s1297_s28, %s1297_s28, %s1298_s29  }
  0x36   : > { %p1116_p2 = pnand %p1115_p4, %p1109_p1 }
  0x38   : > { %1119 = shalt.err (!%p1116_p2)
}
  0x39   : > { %s1659_s3 = sld [smem:[#allocation23_spill]]  ;;  %s52_s16 = sadd.s32 1, %s1280_s11 }
  0x3a   : > { %s43_s24 = sadd.s32 1, %s1288_s13  ;;  %p59_p4 = scmp.ne.s32.totalorder %s1280_s11, %s1276_s10 }
  0x3b   : > { %p45_p6 = scmp.ge.s32.totalorder %s43_s24, 2  ;;  %p60_p12 = scmp.eq.s32.totalorder %s1292_s14, 0 }
  0x3c   : > { %p1660_p0 = scmp.eq.s32.totalorder %s1386_s15, 1  ;;  %p976_p3 = scmp.lt.s32.totalorder %s1292_s14, 2 }
  0x3d   : > { %s1681_s24 = smov (%p45_p6, %s43_s24), 0  ;;  %p61_p10 = por %p60_p12, %p59_p4 }
  0x3e   : > { %p1453_p5 = por %p1660_p0, %p59_p4  ;;  %1662 = sst [smem:[#allocation20_spill]] %s1681_s24 }
  0x3f   : > { %958 = dma.hbm_to_vmem [thread:$0]  (!%p1416_p11), %s1659_s3, 256, %s325_s26, [#allocation9], %s1297_s28, %s1297_s28, %s1298_s29  }
  0x40   : > { %s347_s25 = sand.u32 1, %s1280_s11   ;;  %s47_s27 = ssub.s32 %s1288_s13, %s1681_s24 }
  0x41   : > { %p50_p7 = scmp.eq.s32.totalorder %s47_s27, 0  ;;  %s866_s26 = sshll.u32 %s347_s25, 3 }
  0x42   : > { %s867_s28 = sshll.u32 %s1288_s13, 7  ;;  %s351_s1 = scalar_lea.vmem [#allocation2], %s866_s26 }
  0x43   : > { %s1465_s29 = scalar_select %p50_p7, %s1280_s11, %s52_s16  }
  0x44   : > { %s357_s23 = scalar_lea.hbm %s1634_s0, %s867_s28  ;;  %s359_s2 = sshll.u32 %s351_s1, 4  ;;  %s360_s2 = int_to_ptr.vmem [resolvable:$true] %s359_s2 }
  0x45   : > { %p1472_p11 = pnand %p976_p3, %p61_p10  ;;  %s348_s18 = scalar_lea.sflag [#allocation3], %s347_s25 }
  0x46   : > { %s1133_s27 = scalar_lea.vmem %s360_s2, 128  ;;  %s1299_s16 = smov [#allocation2]  }
  0x47   : > { %p1122_p1 = pneg %p1472_p11  ;;  %p1134_p9 = scmp.ne.s32.totalorder %s360_s2, %s1133_s27 }
  0x48   : > { %s1138_s24 = sshll.u32 %s1299_s16, 4  ;;  %s1139_s24 = int_to_ptr.vmem [resolvable:$false] %s1138_s24 }
  0x49   : > { %p1136_p13 = pnand %p1134_p9, %p1122_p1  ;;  %s1140_s28 = scalar_lea.vmem %s1139_s24, 256 }
  0x4a   : > { %p1141_p4 = scmp.lt.s32.totalorder %s360_s2, %s1139_s24  ;;  %p1142_p6 = scmp.lt.s32.totalorder %s1140_s28, %s1133_s27 }
  0x4b   : > { %p1137_p2 = pneg %p1136_p13 }
  0x4c   : > { %p1143_p12 = por %p1142_p6, %p1141_p4 }
  0x4e   : > { %p1144_p0 = pnand %p1143_p12, %p1137_p2 }
  0x50   : > { %1147 = shalt.err (!%p1144_p0)
}
  0x51   : > { %962 = dma.hbm_to_vmem [thread:$0]  (!%p1472_p11), %s357_s23, 128, %s360_s2, %s348_s18  }
  0x52   : > { %368 = sbr.rel (%p1407_p8) target bundleno = 362 (0x16a), region = 48  ;;  %s1483_s1 = sand.u32 (!%p1407_p8), 1, %s1276_s10  }
  0x53   : > { %s869_s25 = sshll.u32 (!%p1407_p8), %s1483_s1, 3  ;;  %s371_s26 = scalar_lea.sflag (!%p1407_p8), [#allocation3], %s1483_s1 }
  0x54   : > { %s374_s21 = scalar_lea.vmem (!%p1407_p8), [#allocation2], %s869_s25  ;;  %p1664_p3 = scmp.ne.s32.totalorder (!%p1407_p8), %s1652_s17, 0 }
  0x57   : > { %1251 = dma.done.wait (%p1664_p3), %s371_s26, 128  }
  0x58   : > { %1253 = vsyncadd (%p1664_p3), %s371_s26, 4294967168  ;;  %p1665_p10 = scmp.eq.s32.totalorder %s1386_s15, 0 }
  0x5a   : > { %1255 = dma.done.wait (%p1665_p10), [#allocation6], 512   ;;  %p1666_p7 = pmov %p1665_p10 }
  0x5c   : > { %1257 = vsyncadd (%p1666_p7), [#allocation6], 4294966784  ;;  %p1667_p8 = pmov %p1666_p7 }
  0x5d   : > { %p1668_p11 = pmov %p1666_p7 }
  0x5e   : > { %1259 = dma.done.wait (%p1667_p8), [#allocation9], 256  }
  0x5f   : > { %1261 = vsyncadd (%p1668_p11), [#allocation9], 4294967040  ;;  %v1300_v0 = vmov 0.0   ;;  %vm1301_vm0 = vmmov 0   ;;  %v1036_v1 = vld [vmem:[#allocation5 + $0x8] sm:$0xff]   ;;  %v1037_v2 = vld [vmem:[#allocation7 + $0x8] sm:$0xff]  }
  0x60   : > { %905 = vmatprep.subr.bf16.mxu0 %v1300_v0  ;;  %913 = vmatprep.subr.bf16.mxu1 %v1300_v0  ;;  %v1038_v3 = vld [vmem:[#allocation5] sm:$0xff]   ;;  %v1039_v4 = vld [vmem:[#allocation7] sm:$0xff]   ;;  %vm457_vm1 = vcmask 261120   ;;  %v1040_v7 = vld [vmem:[#allocation8 + $0x8] sm:$0xff]   ;;  %s1503_s2 = sshll.u32 %s1483_s1, 2  ;;  %s1513_s20 = sshll.u32 %s1284_s12, 6 }
  0x61   : > { %909 = vmatprep.mubr.msk.bf16.mxu0 %vm1301_vm0, %v1300_v0  ;;  %917 = vmatprep.mubr.msk.bf16.mxu1 %vm1301_vm0, %v1300_v0  ;;  %v432_v5 = vld [vmem:[%s374_s21] sm:$0xff]  ;;  %v1041_v8 = vld [vmem:[#allocation8] sm:$0xff]   ;;  %s416_s23 = scalar_lea.vmem [#allocation10], %s1503_s2  ;;  %s423_s16 = scalar_lea.vmem [#allocation11], %s1503_s2  ;;  %vm502_vm2 = vcmask 257024  }
  0x62   : > { %906 = vmatpush3.bf16.msra.mxu0 %v1036_v1  ;;  %914 = vmatpush3.bf16.msra.mxu1 %v1037_v2  ;;  %v433_v6 = vpack.c.bf16 %v432_v5, %v432_v5  ;;  %v876_v9 = vld [vmem:[%s1638_s4] ss:$0 sm:$0xff]  ;;  %s659_s27 = sshll.u32 %s416_s23, 4  ;;  %s673_s28 = sshll.u32 %s423_s16, 4  ;;  %s1523_s27 = int_to_ptr.vmem [resolvable:$true] %s659_s27  ;;  %s1531_s28 = int_to_ptr.vmem [resolvable:$true] %s673_s28 }
  0x63   : > { %907 = vmatprep.subr.bf16.mxu0 %v1300_v0  ;;  %915 = vmatprep.subr.bf16.mxu1 %v1300_v0  ;;  %v880_v10 = vld [vmem:[%s1639_s5] ss:$0 sm:$0xff]  ;;  %s1521_s12 = scalar_lea.hbm %s1641_s7, %s1513_s20  ;;  %s1529_s17 = scalar_lea.hbm %s1642_s8, %s1513_s20 }
  0x64   : > { %v884_v22 = vld [vmem:[%s1640_s6] ss:$0 sm:$0xff]  ;;  %s635_s25 = scalar_lea.sflag [#allocation4], %s1483_s1  ;;  %s1148_s26 = scalar_lea.vmem %s1523_s27, 64 }
  0x65   : > { %p1149_p1 = scmp.ne.s32.totalorder %s1523_s27, %s1148_s26  ;;  %s1302_s21 = smov [#allocation10]  }
  0x66   : > { %908 = vmatpush3.bf16.msra.mxu0 %v1038_v3  ;;  %916 = vmatpush3.bf16.msra.mxu1 %v1039_v4  ;;  %s1152_s3 = sshll.u32 %s1302_s21, 4  ;;  %s1153_s3 = int_to_ptr.vmem [resolvable:$false] %s1152_s3 }
  0x67   : > { %921 = vmatprep.subr.bf16.mxu0 %v1300_v0  ;;  %p1150_p9 = pnand %p1149_p1, %p1453_p5  ;;  %s1154_s24 = scalar_lea.vmem %s1153_s3, 128 }
  0x68   : > { %p1155_p2 = scmp.lt.s32.totalorder %s1523_s27, %s1153_s3  ;;  %p1156_p4 = scmp.lt.s32.totalorder %s1154_s24, %s1148_s26 }
  0x69   : > { %910 = vmatmul.mubr.msk.bf16.vlgmr.msra.gmra.mxu0 %vm457_vm1, %v433_v6  ;;  %918 = vmatmul.mubr.msk.bf16.vlgmr.msra.gmra.mxu1 %vm457_vm1, %v433_v6  ;;  %p1151_p13 = pneg %p1150_p9 }
  0x6a   : > { %922 = vmatpush3.bf16.msra.mxu0 %v1040_v7  ;;  %925 = vmatprep.mubr.msk.bf16.mxu0 %vm1301_vm0, %v1300_v0  ;;  %p1157_p6 = por %p1156_p4, %p1155_p2 }
  0x6b   : > { %923 = vmatprep.subr.bf16.mxu0 %v1300_v0 }
  0x6c   : > { %p1158_p12 = pnand %p1157_p6, %p1151_p13 }
  0x6e   : > { %924 = vmatpush3.bf16.msra.mxu0 %v1041_v8 }
  0x71   : > { %926 = vmatmul.mubr.msk.bf16.vlgmr.msra.gmra.mxu0 %vm457_vm1, %v433_v6 }
 0x129   : > { %v495_v11 = vpop.f32.mrf.mxu0  ;;  %v561_v13 = vpop.f32.mrf.mxu1 }
 0x12a   : > { %v496_v12 = vadd.f32 %v876_v9, %v495_v11  ;;  %v562_v15 = vadd.f32 %v880_v10, %v561_v13 }
 0x12b   : > { %v911_v14 = vpop.f32.mrf.mxu0  ;;  %v919_v17 = vpop.f32.mrf.mxu1 }
 0x12c   : > { %v501_v16 = vpack.c.bf16 %v496_v12, %v496_v12  ;;  %v567_v18 = vpack.c.bf16 %v562_v15, %v562_v15 }
 0x12d   : > { %v498_v19 = vpop.f32.mrf.mxu0  ;;  %v564_v20 = vpop.f32.mrf.mxu1 }
 0x12e   : > { %503 = vst.msk [vmem:[%s416_s23] sm:$0xf] %vm502_vm2, %v501_v16  ;;  %568 = vst.msk [vmem:[%s423_s16] sm:$0xf] %vm502_vm2, %v567_v18 }
 0x12f   : > { %v912_v21 = vpop.f32.mrf.mxu0 }
 0x130   : > { %1161 = shalt.err (!%p1158_p12)
}
 0x131   : > { %s1162_s23 = scalar_lea.hbm %s1521_s12, 64  ;;  %s1166_s18 = scalar_lea.hbm %s1641_s7, 128 }
 0x132   : > { %p1163_p0 = scmp.ne.s32.totalorder %s1521_s12, %s1162_s23  ;;  %p1167_p7 = scmp.lt.s32.totalorder %s1521_s12, %s1641_s7 }
 0x133   : > { %p1168_p8 = scmp.lt.s32.totalorder %s1166_s18, %s1162_s23 }
 0x134   : > { %p1164_p3 = pnand %p1163_p0, %p1453_p5 }
 0x135   : > { %p1169_p11 = por %p1168_p8, %p1167_p7 }
 0x136   : > { %p1165_p10 = pneg %p1164_p3 }
 0x138   : > { %p1170_p1 = pnand %p1169_p11, %p1165_p10 }
 0x13a   : > { %1173 = shalt.err (!%p1170_p1)
}
 0x13b   : > { %943 = dma.vmem_to_hbm [thread:$0]  (%p1453_p5), %s1523_s27, 64, %s1521_s12, %s635_s25   ;;  %v920_v23 = vpop.f32.mrf.mxu1 }
 0x13c   : > { %s1669_s24 = sand.u32 1, %s1386_s15   ;;  %s1174_s3 = scalar_lea.vmem %s1531_s28, 64 }
 0x13d   : > { %s1561_s26 = scalar_lea.sflag [#allocation12], %s1669_s24  ;;  %p1175_p9 = scmp.ne.s32.totalorder %s1531_s28, %s1174_s3 }
 0x13e   : > { %s1303_s23 = smov [#allocation11]  }
 0x13f   : > { %p1176_p13 = pnand %p1175_p9, %p1453_p5  ;;  %s1178_s1 = sshll.u32 %s1303_s23, 4  ;;  %s1179_s1 = int_to_ptr.vmem [resolvable:$false] %s1178_s1 }
 0x140   : > { %s1180_s16 = scalar_lea.vmem %s1179_s1, 128  ;;  %p1181_p4 = scmp.lt.s32.totalorder %s1531_s28, %s1179_s1 }
 0x141   : > { %p1177_p2 = pneg %p1176_p13  ;;  %p1182_p6 = scmp.lt.s32.totalorder %s1180_s16, %s1174_s3 }
 0x143   : > { %p1183_p12 = por %p1182_p6, %p1181_p4 }
 0x145   : > { %p1184_p0 = pnand %p1183_p12, %p1177_p2 }
 0x147   : > { %1187 = shalt.err (!%p1184_p0)
}
 0x148   : > { %s1188_s15 = scalar_lea.hbm %s1529_s17, 64  ;;  %s1192_s25 = scalar_lea.hbm %s1642_s8, 128 }
 0x149   : > { %p1189_p3 = scmp.ne.s32.totalorder %s1529_s17, %s1188_s15  ;;  %p1193_p8 = scmp.lt.s32.totalorder %s1529_s17, %s1642_s8 }
 0x14a   : > { %p1194_p11 = scmp.lt.s32.totalorder %s1192_s25, %s1188_s15 }
 0x14b   : > { %p1190_p10 = pnand %p1189_p3, %p1453_p5 }
 0x14c   : > { %p1195_p1 = por %p1194_p11, %p1193_p8 }
 0x14d   : > { %p1191_p7 = pneg %p1190_p10 }
 0x14f   : > { %p1196_p9 = pnand %p1195_p1, %p1191_p7 }
 0x151   : > { %1199 = shalt.err (!%p1196_p9)
}
 0x152   : > { %944 = dma.vmem_to_hbm [thread:$0]  (%p1453_p5), %s1531_s28, 64, %s1529_s17, %s1561_s26   ;;  %v626_v24 = vpop.f32.mrf.mxu0 }
 0x153   : > { %s430_s21 = scalar_lea.vmem [#allocation13], %s1503_s2  ;;  %v627_v25 = vadd.f32 %v884_v22, %v626_v24  ;;  %s1589_s1 = scalar_lea.hbm %s1643_s9, %s1513_s20 }
 0x154   : > { %s687_s24 = sshll.u32 %s430_s21, 4  ;;  %v927_v26 = vpop.f32.mrf.mxu0  ;;  %s1304_s2 = smov [#allocation13]   ;;  %s688_s24 = int_to_ptr.vmem [resolvable:$true] %s687_s24 }
 0x155   : > { %v632_v27 = vpack.c.bf16 %v627_v25, %v627_v25  ;;  %s1200_s16 = scalar_lea.vmem %s688_s24, 64  ;;  %s1204_s28 = sshll.u32 %s1304_s2, 4  ;;  %s1205_s28 = int_to_ptr.vmem [resolvable:$false] %s1204_s28 }
 0x156   : > { %v629_v28 = vpop.f32.mrf.mxu0  ;;  %p1201_p13 = scmp.ne.s32.totalorder %s688_s24, %s1200_s16  ;;  %s1206_s17 = scalar_lea.vmem %s1205_s28, 128 }
 0x157   : > { %633 = vst.msk [vmem:[%s430_s21] sm:$0xf] %vm502_vm2, %v632_v27  ;;  %p1207_p6 = scmp.lt.s32.totalorder %s688_s24, %s1205_s28  ;;  %p1208_p12 = scmp.lt.s32.totalorder %s1206_s17, %s1200_s16 }
 0x158   : > { %v928_v29 = vpop.f32.mrf.mxu0  ;;  %p1202_p2 = pnand %p1201_p13, %p1453_p5 }
 0x159   : > { %p1209_p0 = por %p1208_p12, %p1207_p6 }
 0x15a   : > { %p1203_p4 = pneg %p1202_p2 }
 0x15c   : > { %p1210_p3 = pnand %p1209_p0, %p1203_p4 }
 0x15e   : > { %1213 = shalt.err (!%p1210_p3)
}
 0x15f   : > { %s1214_s20 = scalar_lea.hbm %s1589_s1, 64  ;;  %s1218_s12 = scalar_lea.hbm %s1643_s9, 128 }
 0x160   : > { %p1215_p10 = scmp.ne.s32.totalorder %s1589_s1, %s1214_s20  ;;  %p1219_p11 = scmp.lt.s32.totalorder %s1589_s1, %s1643_s9 }
 0x161   : > { %p1220_p1 = scmp.lt.s32.totalorder %s1218_s12, %s1214_s20 }
 0x162   : > { %p1216_p7 = pnand %p1215_p10, %p1453_p5 }
 0x163   : > { %p1221_p9 = por %p1220_p1, %p1219_p11 }
 0x164   : > { %p1217_p8 = pneg %p1216_p7 }
 0x166   : > { %p1222_p13 = pnand %p1221_p9, %p1217_p8 }
 0x168   : > { %1225 = shalt.err (!%p1222_p13)
}
 0x169   : > { %945 = dma.vmem_to_hbm [thread:$0]  (%p1453_p5), %s688_s24, 64, %s1589_s1, %s1561_s26  }
 0x16a PF: > { %s1670_s19 = sld [smem:[#allocation19_spill]]  ;;  %s699_s21 = sand.u32 1, %s1272_s30  }
 0x16b   : > { %p1672_p4 = scmp.ge.s32.totalorder %s1292_s14, 2  ;;  %s700_s3 = scalar_lea.sflag [#allocation4], %s699_s21 }
 0x170   : > { %p1671_p2 = scmp.ne.s32.totalorder %s1670_s19, 0 }
 0x172   : > { %p964_p6 = pnand %p1672_p4, %p1671_p2 }
 0x174   : > { %p965_p12 = pneg %p964_p6 }
 0x176   : > { %1263 = dma.done.wait (%p965_p12), %s700_s3, 64  }
 0x177   : > { %1265 = vsyncadd (%p965_p12), %s700_s3, 4294967232  ;;  %s1673_s23 = sadd.s32 4294967294, %s1292_s14  }
 0x178   : > { %s708_s16 = sand.u32 1, %s1673_s23  }
 0x179   : > { %s709_s2 = scalar_lea.sflag [#allocation12], %s708_s16 }
 0x17a   : > { %1267 = dma.done.wait (%p965_p12), %s709_s2, 128  }
 0x17b   : > { %1269 = vsyncadd (%p965_p12), %s709_s2, 4294967168  ;;  %s31_s14 = sadd.s32 1, %s1292_s14   ;;  %s1674_s22 = sld [smem:[#allocation20_spill]] }
 0x17c   : > { %p28_p5 = scmp.ge.s32.totalorder %s31_s14, 4   ;;  %s1675_s30 = smov %s1276_s10 }
 0x17d   : > { %s1676_s10 = smov %s1280_s11  ;;  %s1677_s11 = smov %s1465_s29 }
 0x17e   : > { %s1678_s12 = smov %s1288_s13  ;;  %30 = sbr.rel (!%p28_p5) target bundleno = 14 (0xe), region = 137 }
 0x181   : > { %s1679_s13 = smov %s1674_s22 }
 0x183   :  { %723 = vsyncpa [#allocation3], 1 }
 0x184   :  { %725 = vsyncpa [#allocation3 + $0x1], 1 }
 0x185   :  { %726 = vsyncpa [#allocation6], 1 }
 0x186   :  { %727 = vsyncpa [#allocation9], 1 }
 0x187   :  { %728 = vsyncpa [#allocation4], 1 }
 0x188   :  { %730 = vsyncpa [#allocation4 + $0x1], 1 }
 0x189   :  { %731 = vsyncpa [#allocation12], 1 }
 0x18a   :  { %733 = vsyncpa [#allocation12 + $0x1], 1 }

</bundles_post_ra>
